<compile_context>
chip_gen: v7x
topology: tpu7x:2x2x1
jax: 0.10.0
libtpu: 0.0.40
codegen_flags: <defaults>
</compile_context>

<pallas_src>
import math

import jax
import jax.numpy as jnp
from jax.experimental import pallas as pl
from jax.experimental.pallas import tpu as pltpu


def _round_up(n, m):
    return ((n + m - 1) // m) * m


def _cdiv(a, b):
    return (a + b - 1) // b


# ----------------------------------------------------------------------------
# Kernel: one batch tile of the 4-layer MLP.
# ----------------------------------------------------------------------------
def discriminator_kernel(
    x_ref,            # [TB, NZP]   f32/bf16 (streamed)
    w1_ref, b1_ref,   # [NZP, NZP]  bf16, [1, NZP] f32 (resident)
    w2_ref, b2_ref,   # [NZP, NZP]  bf16, [1, NZP] f32 (resident)
    w3_ref, b3_ref,   # [NZP, NZP]  bf16, [1, NZP] f32 (resident)
    w4_ref, b4_ref,   # [1, NZP]    f32,  [1, 1]   f32 (resident)
    o_ref,            # [TB, 1]     f32
):
    # Cast the streamed activations to bf16 in-kernel (saves the wrapper-side
    # HBM round trip); every matmul accumulates in f32 on the MXU.
    x = x_ref[...].astype(jnp.bfloat16)

    # Layer 1.
    h = jnp.dot(x, w1_ref[...], preferred_element_type=jnp.float32)
    h = jnp.maximum(h + b1_ref[...], 0.0).astype(jnp.bfloat16)

    # Layer 2.
    h = jnp.dot(h, w2_ref[...], preferred_element_type=jnp.float32)
    h = jnp.maximum(h + b2_ref[...], 0.0).astype(jnp.bfloat16)

    # Layer 3 (stay f32 for the final lane reduction).
    h = jnp.dot(h, w3_ref[...], preferred_element_type=jnp.float32)
    h = jnp.maximum(h + b3_ref[...], 0.0)

    # Layer 4: N=1 projection as VPU multiply + XLU lane reduction
    # (avoids a full MXU pass for a 1-wide output tile).
    out = jnp.sum(h * w4_ref[...], axis=-1, keepdims=True) + b4_ref[...]
    o_ref[...] = out.astype(o_ref.dtype)


# ----------------------------------------------------------------------------
# One-time parameter preparation (pad + cast, hoisted out of the forward).
# ----------------------------------------------------------------------------
def _feature_width(nz):
    # Always 128-lane aligned; prefer 256-alignment (v6e/v7x 256-wide MXU)
    # when nz > 128 and the extra padding overhead is < 25%.
    p128 = _round_up(nz, 128)
    if nz > 128:
        p256 = _round_up(nz, 256)
        if p256 * 4 <= nz * 5:
            return p256
    return p128


def prepare_params(params, *, nz):
    """Pad + cast the weights once; reuse the result across forward calls."""
    (w1, b1), (w2, b2), (w3, b3), (w4, b4) = params
    NZ_P = _feature_width(nz)
    pf = NZ_P - nz

    def pad_w(w):   # [nz, nz] -> [NZ_P, NZ_P] bf16
        return jnp.pad(w, ((0, pf), (0, pf))).astype(jnp.bfloat16)

    def pad_b(b):   # [1, nz] -> [1, NZ_P] f32
        return jnp.pad(b, ((0, 0), (0, pf))).astype(jnp.float32)

    return dict(
        nz=nz,
        nz_p=NZ_P,
        w1=pad_w(w1), b1=pad_b(b1),
        w2=pad_w(w2), b2=pad_b(b2),
        w3=pad_w(w3), b3=pad_b(b3),
        w4=jnp.pad(jnp.reshape(w4, (1, nz)), ((0, 0), (0, pf))).astype(jnp.float32),
        b4=jnp.reshape(b4, (1, 1)).astype(jnp.float32),
    )


# ----------------------------------------------------------------------------
# Adaptive batch tiling.
# ----------------------------------------------------------------------------
def _batch_tiling(B, NZ_P, tile_b_max):
    # Keep the double-buffered x tile + f32 temporaries modest at large NZ_P.
    tile_b_max = max(256, min(tile_b_max, (8 << 20) // (NZ_P * 4)))
    B8 = _round_up(max(B, 1), 8)
    if B8 <= 16:
        return B8, B8                         # tiny batch: single grid step
    # >= 2 grid steps so both v7x TensorCores get work; tile chosen from
    # ceil(B / num_tiles) (rounded to 8) so batch padding stays small.
    num_tiles = max(2, _cdiv(B8, tile_b_max))
    tile_b = _round_up(_cdiv(B8, num_tiles), 8)
    return tile_b, num_tiles * tile_b


# ----------------------------------------------------------------------------
# Forward wrapper: view(-1, nz), minimal padding, pallas_call plumbing.
# ----------------------------------------------------------------------------
def discriminator_forward(x, prepared, *, tile_b_max=2048):
    nz, NZ_P = prepared["nz"], prepared["nz_p"]

    # PyTorch: x = x.view(-1, self.nz)
    x2d = jnp.reshape(x, (-1, nz))
    if x2d.dtype not in (jnp.bfloat16, jnp.float32):
        x2d = x2d.astype(jnp.float32)
    B = x2d.shape[0]

    tile_b, B_p = _batch_tiling(B, NZ_P, tile_b_max)

    # Only pad x when actually required (unaligned nz / partial last tile);
    # for aligned shapes x streams straight from HBM with no wrapper copy.
    pf, pb = NZ_P - nz, B_p - B
    x_p = jnp.pad(x2d, ((0, pb), (0, pf))) if (pf or pb) else x2d

    grid = (B_p // tile_b,)
    const2 = lambda i: (0, 0)   # weights/biases resident across grid steps

    # Single-buffer the resident square weights when double-buffering them
    # would cost meaningful VMEM (large nz); no effect at small nz.
    single_buffer_w = (2 * 3 * NZ_P * NZ_P * 2) > (8 << 20)
    if single_buffer_w:
        w_spec = pl.BlockSpec((NZ_P, NZ_P), const2, pipeline_mode=pl.Buffered(1))
    else:
        w_spec = pl.BlockSpec((NZ_P, NZ_P), const2)
    b_spec = pl.BlockSpec((1, NZ_P), const2)

    in_specs = [
        pl.BlockSpec((tile_b, NZ_P), lambda i: (i, 0)),   # x (streamed)
        w_spec, b_spec,
        w_spec, b_spec,
        w_spec, b_spec,
        pl.BlockSpec((1, NZ_P), const2), pl.BlockSpec((1, 1), const2),
    ]
    out_spec = pl.BlockSpec((tile_b, 1), lambda i: (i, 0))

    x_bytes = jnp.dtype(x_p.dtype).itemsize
    flops = 2 * B_p * NZ_P * NZ_P * 3 + 2 * B_p * NZ_P
    bytes_accessed = (
        B_p * NZ_P * x_bytes          # x stream
        + 3 * NZ_P * NZ_P * 2         # square weights (bf16)
        + (4 * NZ_P + 1) * 4          # biases + w4 row + b4 (f32)
        + B_p * 4                     # output (f32)
    )

    # VMEM budget from the actual footprint (+50% headroom), floored at the
    # 32 MiB scoped default.
    w_bufs = 1 if single_buffer_w else 2
    vmem_needed = (
        w_bufs * 3 * NZ_P * NZ_P * 2          # square weights
        + 2 * (4 * NZ_P + 1) * 4              # biases + w4 row + b4
        + 2 * tile_b * NZ_P * x_bytes         # x tiles (double-buffered)
        + 2 * tile_b * 4                      # output tiles
        + 3 * tile_b * NZ_P * 4               # in-kernel f32/bf16 temporaries
    )
    vmem_limit = int(min(max(32 * 1024 * 1024, (vmem_needed * 3) // 2),
                         100 * 1024 * 1024))

    out = pl.pallas_call(
        discriminator_kernel,
        out_shape=jax.ShapeDtypeStruct((B_p, 1), jnp.float32),
        grid=grid,
        in_specs=in_specs,
        out_specs=out_spec,
        compiler_params=pltpu.CompilerParams(
            dimension_semantics=("parallel",),
            vmem_limit_bytes=vmem_limit,
        ),
        cost_estimate=pl.CostEstimate(
            flops=flops, transcendentals=0, bytes_accessed=bytes_accessed
        ),
    )(x_p,
      prepared["w1"], prepared["b1"],
      prepared["w2"], prepared["b2"],
      prepared["w3"], prepared["b3"],
      prepared["w4"], prepared["b4"])

    return out[:B]


# ----------------------------------------------------------------------------
# Deterministic parameter init (PyTorch nn.Linear default U(-1/sqrt(fan_in))).
# Weights stored transposed as [in, out]; biases as [1, out].
# ----------------------------------------------------------------------------
def init_params(key, dim, nz):
    shapes = [(dim, nz), (nz, nz), (nz, nz), (nz, 1)]  # (fan_in, fan_out)
    params = []
    for (fan_in, fan_out) in shapes:
        key, kw, kb = jax.random.split(key, 3)
        bound = 1.0 / math.sqrt(fan_in)
        w_t = jax.random.uniform(kw, (fan_in, fan_out), jnp.float32, -bound, bound)
        b = jax.random.uniform(kb, (1, fan_out), jnp.float32, -bound, bound)
        params.append((w_t, b))
    return params


# ----------------------------------------------------------------------------
# References for correctness checking.
# ----------------------------------------------------------------------------
def reference_forward_f32(x, params, *, nz):
    h = jnp.reshape(x, (-1, nz)).astype(jnp.float32)
    (w1, b1), (w2, b2), (w3, b3), (w4, b4) = params
    h = jnp.maximum(h @ w1 + b1, 0.0)
    h = jnp.maximum(h @ w2 + b2, 0.0)
    h = jnp.maximum(h @ w3 + b3, 0.0)
    return h @ w4 + b4


def reference_forward_bf16(x, params, *, nz):
    # Mirrors the kernel's bf16 storage / f32 accumulation exactly.
    h = jnp.reshape(x, (-1, nz)).astype(jnp.float32)
    (w1, b1), (w2, b2), (w3, b3), (w4, b4) = params

    def layer(h, w, b):
        y = jnp.dot(h.astype(jnp.bfloat16), w.astype(jnp.bfloat16),
                    preferred_element_type=jnp.float32)
        return jnp.maximum(y + b, 0.0)

    h = layer(h, w1, b1)
    h = layer(h, w2, b2)
    h = layer(h, w3, b3)
    return jnp.sum(h * jnp.reshape(w4, (1, nz)), axis=-1, keepdims=True) + b4


if __name__ == "__main__":
    key = jax.random.PRNGKey(0)

    # --- Test 1: lane-aligned nz=dim=128, B=8 (single grid step, no padding) -
    NZ = 128
    key, kx, kp = jax.random.split(key, 3)
    x = jax.random.normal(kx, (2, 4, NZ), jnp.float32)      # view(-1,128) -> [8,128]
    params = init_params(kp, NZ, NZ)
    prep = prepare_params(params, nz=NZ)
    out = jax.block_until_ready(discriminator_forward(x, prep))
    assert out.shape == (8, 1), out.shape
    assert jnp.allclose(out, reference_forward_bf16(x, params, nz=NZ),
                        atol=5e-3, rtol=5e-3)
    assert jnp.allclose(out, reference_forward_f32(x, params, nz=NZ),
                        atol=1e-1, rtol=1e-1)

    # --- Test 2: non-aligned nz=96 (feature + batch padding, 2 grid steps) ---
    NZ2 = 96
    key, kx2, kp2 = jax.random.split(key, 3)
    x2 = jax.random.normal(kx2, (5, 4, NZ2), jnp.float32)   # -> [20, 96]
    params2 = init_params(kp2, NZ2, NZ2)
    prep2 = prepare_params(params2, nz=NZ2)
    out2 = jax.block_until_ready(discriminator_forward(x2, prep2))
    assert out2.shape == (20, 1), out2.shape
    assert jnp.allclose(out2, reference_forward_bf16(x2, params2, nz=NZ2),
                        atol=5e-3, rtol=5e-3)
    assert jnp.allclose(out2, reference_forward_f32(x2, params2, nz=NZ2),
                        atol=1e-1, rtol=1e-1)

    # --- Test 3: aligned nz, partial last batch tile, 2 grid steps -----------
    NZ3 = 128
    key, kx3, kp3 = jax.random.split(key, 3)
    x3 = jax.random.normal(kx3, (5, 4, NZ3), jnp.float32)   # -> [20, 128]
    params3 = init_params(kp3, NZ3, NZ3)
    prep3 = prepare_params(params3, nz=NZ3)
    out3 = jax.block_until_ready(discriminator_forward(x3, prep3))
    assert out3.shape == (20, 1), out3.shape
    assert jnp.allclose(out3, reference_forward_bf16(x3, params3, nz=NZ3),
                        atol=5e-3, rtol=5e-3)
    assert jnp.allclose(out3, reference_forward_f32(x3, params3, nz=NZ3),
                        atol=1e-1, rtol=1e-1)

    print("KERNEL_OK")
</pallas_src>

<mosaic_0001>
module attributes {stable_mosaic.version = 11 : i64} {
  func.func @discriminator_kernel(%arg0: i32, %arg1: memref<8x128xf32, #tpu.memory_space<vmem>>, %arg2: memref<128x128xbf16, #tpu.memory_space<vmem>>, %arg3: memref<1x128xf32, #tpu.memory_space<vmem>>, %arg4: memref<128x128xbf16, #tpu.memory_space<vmem>>, %arg5: memref<1x128xf32, #tpu.memory_space<vmem>>, %arg6: memref<128x128xbf16, #tpu.memory_space<vmem>>, %arg7: memref<1x128xf32, #tpu.memory_space<vmem>>, %arg8: memref<1x128xf32, #tpu.memory_space<vmem>>, %arg9: memref<1x1xf32, #tpu.memory_space<vmem>>, %arg10: memref<8x1xf32, #tpu.memory_space<vmem>>) attributes {dimension_semantics = [#tpu.dimension_semantics<parallel>], iteration_bounds = array<i64: 1>, scalar_prefetch = 0 : i64, scratch_operands = 0 : i64, tpu.core_type = #tpu.core_type<tc>, window_params = [{transform_indices = @transform_0, window_bounds = array<i64: 8, 128>}, {pipeline_mode = #tpu.pipeline_mode<synchronous>, transform_indices = @transform_1, window_bounds = array<i64: 128, 128>}, {pipeline_mode = #tpu.pipeline_mode<synchronous>, transform_indices = @transform_2, window_bounds = array<i64: 1, 128>}, {pipeline_mode = #tpu.pipeline_mode<synchronous>, transform_indices = @transform_3, window_bounds = array<i64: 128, 128>}, {pipeline_mode = #tpu.pipeline_mode<synchronous>, transform_indices = @transform_4, window_bounds = array<i64: 1, 128>}, {pipeline_mode = #tpu.pipeline_mode<synchronous>, transform_indices = @transform_5, window_bounds = array<i64: 128, 128>}, {pipeline_mode = #tpu.pipeline_mode<synchronous>, transform_indices = @transform_6, window_bounds = array<i64: 1, 128>}, {pipeline_mode = #tpu.pipeline_mode<synchronous>, transform_indices = @transform_7, window_bounds = array<i64: 1, 128>}, {pipeline_mode = #tpu.pipeline_mode<synchronous>, transform_indices = @transform_8, window_bounds = array<i64: 1, 1>}, {transform_indices = @transform_9, window_bounds = array<i64: 8, 1>}]} {
    %c0 = arith.constant 0 : index
    %c0_0 = arith.constant 0 : index
    %0 = vector.load %arg1[%c0, %c0_0] : memref<8x128xf32, #tpu.memory_space<vmem>>, vector<8x128xf32>
    %1 = arith.truncf %0 : vector<8x128xf32> to vector<8x128xbf16>
    %c0_1 = arith.constant 0 : index
    %c0_2 = arith.constant 0 : index
    %2 = vector.load %arg2[%c0_1, %c0_2] : memref<128x128xbf16, #tpu.memory_space<vmem>>, vector<128x128xbf16>
    %cst = arith.constant dense<0.000000e+00> : vector<8x128xf32>
    %3 = tpu.matmul %1, %2, %cst {dimension_numbers = #tpu.dot_dimension_numbers<[1], [0], [0], [1], [0, 0, 1, 1], [], []>} : vector<8x128xbf16>, vector<128x128xbf16>, vector<8x128xf32> -> vector<8x128xf32>
    %c0_3 = arith.constant 0 : index
    %c0_4 = arith.constant 0 : index
    %4 = vector.load %arg3[%c0_3, %c0_4] : memref<1x128xf32, #tpu.memory_space<vmem>>, vector<1x128xf32>
    %5 = vector.broadcast %4 : vector<1x128xf32> to vector<8x128xf32>
    %6 = arith.addf %3, %5 : vector<8x128xf32>
    %cst_5 = arith.constant 0.000000e+00 : f32
    %7 = vector.broadcast %cst_5 : f32 to vector<8x128xf32>
    %8 = arith.maximumf %6, %7 : vector<8x128xf32>
    %9 = arith.truncf %8 : vector<8x128xf32> to vector<8x128xbf16>
    %c0_6 = arith.constant 0 : index
    %c0_7 = arith.constant 0 : index
    %10 = vector.load %arg4[%c0_6, %c0_7] : memref<128x128xbf16, #tpu.memory_space<vmem>>, vector<128x128xbf16>
    %cst_8 = arith.constant dense<0.000000e+00> : vector<8x128xf32>
    %11 = tpu.matmul %9, %10, %cst_8 {dimension_numbers = #tpu.dot_dimension_numbers<[1], [0], [0], [1], [0, 0, 1, 1], [], []>} : vector<8x128xbf16>, vector<128x128xbf16>, vector<8x128xf32> -> vector<8x128xf32>
    %c0_9 = arith.constant 0 : index
    %c0_10 = arith.constant 0 : index
    %12 = vector.load %arg5[%c0_9, %c0_10] : memref<1x128xf32, #tpu.memory_space<vmem>>, vector<1x128xf32>
    %13 = vector.broadcast %12 : vector<1x128xf32> to vector<8x128xf32>
    %14 = arith.addf %11, %13 : vector<8x128xf32>
    %cst_11 = arith.constant 0.000000e+00 : f32
    %15 = vector.broadcast %cst_11 : f32 to vector<8x128xf32>
    %16 = arith.maximumf %14, %15 : vector<8x128xf32>
    %17 = arith.truncf %16 : vector<8x128xf32> to vector<8x128xbf16>
    %c0_12 = arith.constant 0 : index
    %c0_13 = arith.constant 0 : index
    %18 = vector.load %arg6[%c0_12, %c0_13] : memref<128x128xbf16, #tpu.memory_space<vmem>>, vector<128x128xbf16>
    %cst_14 = arith.constant dense<0.000000e+00> : vector<8x128xf32>
    %19 = tpu.matmul %17, %18, %cst_14 {dimension_numbers = #tpu.dot_dimension_numbers<[1], [0], [0], [1], [0, 0, 1, 1], [], []>} : vector<8x128xbf16>, vector<128x128xbf16>, vector<8x128xf32> -> vector<8x128xf32>
    %c0_15 = arith.constant 0 : index
    %c0_16 = arith.constant 0 : index
    %20 = vector.load %arg7[%c0_15, %c0_16] : memref<1x128xf32, #tpu.memory_space<vmem>>, vector<1x128xf32>
    %21 = vector.broadcast %20 : vector<1x128xf32> to vector<8x128xf32>
    %22 = arith.addf %19, %21 : vector<8x128xf32>
    %cst_17 = arith.constant 0.000000e+00 : f32
    %23 = vector.broadcast %cst_17 : f32 to vector<8x128xf32>
    %24 = arith.maximumf %22, %23 : vector<8x128xf32>
    %c0_18 = arith.constant 0 : index
    %c0_19 = arith.constant 0 : index
    %25 = vector.load %arg8[%c0_18, %c0_19] : memref<1x128xf32, #tpu.memory_space<vmem>>, vector<1x128xf32>
    %26 = vector.broadcast %25 : vector<1x128xf32> to vector<8x128xf32>
    %27 = arith.mulf %24, %26 : vector<8x128xf32>
    %cst_20 = arith.constant dense<0.000000e+00> : vector<8xf32>
    %28 = vector.multi_reduction <add>, %27, %cst_20 [1] : vector<8x128xf32> to vector<8xf32>
    %29 = vector.shape_cast %28 : vector<8xf32> to vector<8x1xf32>
    %c0_21 = arith.constant 0 : index
    %c0_22 = arith.constant 0 : index
    %30 = vector.load %arg9[%c0_21, %c0_22] : memref<1x1xf32, #tpu.memory_space<vmem>>, vector<1x1xf32>
    %31 = vector.broadcast %30 : vector<1x1xf32> to vector<8x1xf32>
    %32 = arith.addf %29, %31 : vector<8x1xf32>
    %c0_23 = arith.constant 0 : index
    %c0_24 = arith.constant 0 : index
    %33 = vector.load %arg10[%c0_23, %c0_24] : memref<8x1xf32, #tpu.memory_space<vmem>>, vector<8x1xf32>
    tpu.vector_store %arg10[%c0_23, %c0_24], %32 {strides = array<i32>} : memref<8x1xf32, #tpu.memory_space<vmem>>, vector<8x1xf32>,
    return
  }
  func.func @transform_0(%arg0: i32) -> (i32, i32) {
    %c0_i32 = arith.constant 0 : i32
    %c0_i32_0 = arith.constant 0 : i32
    return %arg0, %c0_i32 : i32, i32
  }
  func.func @transform_1(%arg0: i32) -> (i32, i32) {
    %c0_i32 = arith.constant 0 : i32
    %c0_i32_0 = arith.constant 0 : i32
    %c0_i32_1 = arith.constant 0 : i32
    return %c0_i32, %c0_i32_0 : i32, i32
  }
  func.func @transform_2(%arg0: i32) -> (i32, i32) {
    %c0_i32 = arith.constant 0 : i32
    %c0_i32_0 = arith.constant 0 : i32
    %c0_i32_1 = arith.constant 0 : i32
    return %c0_i32, %c0_i32_0 : i32, i32
  }
  func.func @transform_3(%arg0: i32) -> (i32, i32) {
    %c0_i32 = arith.constant 0 : i32
    %c0_i32_0 = arith.constant 0 : i32
    %c0_i32_1 = arith.constant 0 : i32
    return %c0_i32, %c0_i32_0 : i32, i32
  }
  func.func @transform_4(%arg0: i32) -> (i32, i32) {
    %c0_i32 = arith.constant 0 : i32
    %c0_i32_0 = arith.constant 0 : i32
    %c0_i32_1 = arith.constant 0 : i32
    return %c0_i32, %c0_i32_0 : i32, i32
  }
  func.func @transform_5(%arg0: i32) -> (i32, i32) {
    %c0_i32 = arith.constant 0 : i32
    %c0_i32_0 = arith.constant 0 : i32
    %c0_i32_1 = arith.constant 0 : i32
    return %c0_i32, %c0_i32_0 : i32, i32
  }
  func.func @transform_6(%arg0: i32) -> (i32, i32) {
    %c0_i32 = arith.constant 0 : i32
    %c0_i32_0 = arith.constant 0 : i32
    %c0_i32_1 = arith.constant 0 : i32
    return %c0_i32, %c0_i32_0 : i32, i32
  }
  func.func @transform_7(%arg0: i32) -> (i32, i32) {
    %c0_i32 = arith.constant 0 : i32
    %c0_i32_0 = arith.constant 0 : i32
    %c0_i32_1 = arith.constant 0 : i32
    return %c0_i32, %c0_i32_0 : i32, i32
  }
  func.func @transform_8(%arg0: i32) -> (i32, i32) {
    %c0_i32 = arith.constant 0 : i32
    %c0_i32_0 = arith.constant 0 : i32
    %c0_i32_1 = arith.constant 0 : i32
    return %c0_i32, %c0_i32_0 : i32, i32
  }
  func.func @transform_9(%arg0: i32) -> (i32, i32) {
    %c0_i32 = arith.constant 0 : i32
    %c0_i32_0 = arith.constant 0 : i32
    return %arg0, %c0_i32 : i32, i32
  }
}

</mosaic_0001>

<bundles_post_ra>
// kernel: tpu_custom_call.1
= control target key start
LH: loop header
LB: loop body
LE: loop exit
PB: predicated region body
PF: predicated region fallthrough
CT: control target
= control target key end

     0   :  { %s860_s0 = inlined_call_operand.hbm [shape: f32[8,128], index: 0, kind: input, shape index: {}]   ;;  %s861_s1 = inlined_call_operand.hbm [shape: bf16[128,128], index: 1, kind: input, shape index: {}]   ;;  %s862_s2 = inlined_call_operand.vmem [shape: f32[1,128], index: 2, kind: input, shape index: {}]   ;;  %s863_s3 = inlined_call_operand.hbm [shape: bf16[128,128], index: 3, kind: input, shape index: {}]   ;;  %s864_s4 = inlined_call_operand.vmem [shape: f32[1,128], index: 4, kind: input, shape index: {}]   ;;  %s865_s5 = inlined_call_operand.hbm [shape: bf16[128,128], index: 5, kind: input, shape index: {}]   ;;  %s866_s6 = inlined_call_operand.vmem [shape: f32[1,128], index: 6, kind: input, shape index: {}]   ;;  %s867_s7 = inlined_call_operand.vmem [shape: f32[1,128], index: 7, kind: input, shape index: {}]   ;;  %s868_s8 = inlined_call_operand.<no memory space> [shape: f32[1,1], index: 8, kind: input, shape index: {}]   ;;  %s869_s9 = inlined_call_operand.vmem [shape: f32[8,1], index: 9, kind: output, shape index: {}]  }
   0x1   :  { %v14_v0 = vstv %s868_s8 }
   0x2   :  { %15 = vst [vmem:[#allocation2] sm:$0x1] %v14_v0 }
   0x3   :  { %16 = vsyncpa [#allocation4], 0 }
   0x4   :  { %17 = vsyncpa [#allocation6], 0 }
   0x5   :  { %18 = vsyncpa [#allocation9], 0  ;;  %s697_s11 = smov [#allocation5]   ;;  %s603_s15 = scalar_lea.hbm %s861_s1, 1024 }
   0x6   :  { %s34_s12 = sshll.u32 %s697_s11, 4  ;;  %p604_p0 = scmp.ne.s32.totalorder %s861_s1, %s603_s15  ;;  %s35_s12 = int_to_ptr.vmem [resolvable:$true] %s34_s12 }
   0x7   :  { %p607_p1 = scmp.lt.u32.totalorder %s603_s15, %s861_s1 }
   0x9   :  { %p609_p2 = pnand %p607_p1, %p604_p0 }
   0xb   :  { %612 = shalt.err (!%p609_p2)
}
   0xc   :  { %s613_s8 = scalar_lea.vmem %s35_s12, 1024  ;;  %p618_p4 = scmp.lt.s32.totalorder %s35_s12, %s35_s12 }
   0xd   :  { %p614_p3 = scmp.ne.s32.totalorder %s35_s12, %s613_s8  ;;  %p619_p5 = scmp.lt.s32.totalorder %s613_s8, %s613_s8 }
   0xf   :  { %p620_p6 = por %p619_p5, %p618_p4 }
  0x11   :  { %p621_p7 = pnand %p620_p6, %p614_p3 }
  0x13   :  { %624 = shalt.err (!%p621_p7)
}
  0x14   :  { %s698_s20 = smov 64   ;;  %s699_s21 = smov 4  }
  0x15   :  { %40 = dma.hbm_to_vmem [thread:$0]  %s861_s1, 1024, %s35_s12, [#allocation6], %s698_s20, %s698_s20, %s699_s21  }
  0x16   :  { %s700_s24 = smov [#allocation3]   ;;  %s701_s26 = smov [#allocation7]  }
  0x17   :  { %s25_s25 = sshll.u32 %s700_s24, 4  ;;  %s48_s27 = sshll.u32 %s701_s26, 4  ;;  %s26_s25 = int_to_ptr.vmem [resolvable:$true] %s25_s25  ;;  %s49_s27 = int_to_ptr.vmem [resolvable:$true] %s48_s27 }
  0x18   :  { %s625_s30 = scalar_lea.hbm %s860_s0, 128 }
  0x19   :  { %p626_p8 = scmp.ne.s32.totalorder %s860_s0, %s625_s30  ;;  %p629_p9 = scmp.lt.u32.totalorder %s625_s30, %s860_s0 }
  0x1b   :  { %p631_p10 = pnand %p629_p9, %p626_p8 }
  0x1d   :  { %634 = shalt.err (!%p631_p10)
}
  0x1e   :  { %s635_s1 = scalar_lea.vmem %s26_s25, 128  ;;  %p640_p12 = scmp.lt.s32.totalorder %s26_s25, %s26_s25 }
  0x1f   :  { %p636_p11 = scmp.ne.s32.totalorder %s26_s25, %s635_s1  ;;  %p641_p13 = scmp.lt.s32.totalorder %s635_s1, %s635_s1 }
  0x21   :  { %p642_p0 = por %p641_p13, %p640_p12 }
  0x23   :  { %p643_p1 = pnand %p642_p0, %p636_p11 }
  0x25   :  { %646 = shalt.err (!%p643_p1)
}
  0x26   :  { %28 = dma.hbm_to_vmem [thread:$0]  %s860_s0, 128, %s26_s25, [#allocation4]  }
  0x27   :  { %s647_s18 = scalar_lea.hbm %s863_s3, 1024 }
  0x28   :  { %p648_p2 = scmp.ne.s32.totalorder %s863_s3, %s647_s18  ;;  %p651_p3 = scmp.lt.u32.totalorder %s647_s18, %s863_s3 }
  0x2a   :  { %p653_p4 = pnand %p651_p3, %p648_p2 }
  0x2c   :  { %656 = shalt.err (!%p653_p4)
}
  0x2d   :  { %s657_s24 = scalar_lea.vmem %s49_s27, 1024  ;;  %p662_p6 = scmp.lt.s32.totalorder %s49_s27, %s49_s27 }
  0x2e   :  { %p658_p5 = scmp.ne.s32.totalorder %s49_s27, %s657_s24  ;;  %p663_p7 = scmp.lt.s32.totalorder %s657_s24, %s657_s24 }
  0x30   :  { %p664_p8 = por %p663_p7, %p662_p6 }
  0x32   :  { %p665_p9 = pnand %p664_p8, %p658_p5 }
  0x34   :  { %668 = shalt.err (!%p665_p9)
}
  0x35   :  { %54 = dma.hbm_to_vmem [thread:$0]  %s863_s3, 1024, %s49_s27, [#allocation6], %s698_s20, %s698_s20, %s699_s21  }
  0x36   :  { %s702_s26 = smov [#allocation8]   ;;  %s669_s10 = scalar_lea.hbm %s865_s5, 1024 }
  0x37   :  { %s62_s28 = sshll.u32 %s702_s26, 4  ;;  %p670_p10 = scmp.ne.s32.totalorder %s865_s5, %s669_s10  ;;  %s63_s28 = int_to_ptr.vmem [resolvable:$true] %s62_s28 }
  0x38   :  { %p673_p11 = scmp.lt.u32.totalorder %s669_s10, %s865_s5 }
  0x3a   :  { %p675_p12 = pnand %p673_p11, %p670_p10 }
  0x3c   :  { %678 = shalt.err (!%p675_p12)
}
  0x3d   :  { %s679_s12 = scalar_lea.vmem %s63_s28, 1024  ;;  %p684_p0 = scmp.lt.s32.totalorder %s63_s28, %s63_s28 }
  0x3e   :  { %p680_p13 = scmp.ne.s32.totalorder %s63_s28, %s679_s12  ;;  %p685_p1 = scmp.lt.s32.totalorder %s679_s12, %s679_s12 }
  0x40   :  { %p686_p2 = por %p685_p1, %p684_p0 }
  0x42   :  { %p687_p3 = pnand %p686_p2, %p680_p13 }
  0x44   :  { %690 = shalt.err (!%p687_p3)
}
  0x45   :  { %68 = dma.hbm_to_vmem [thread:$0]  %s865_s5, 1024, %s63_s28, [#allocation9], %s698_s20, %s698_s20, %s699_s21  }
  0x46   :  { %691 = dma.done.wait [#allocation4], 128  }
  0x47   :  { %692 = vsyncadd [#allocation4], 4294967168 }
  0x48   :  { %693 = dma.done.wait [#allocation6], 2048  }
  0x49   :  { %694 = vsyncadd [#allocation6], 4294965248 }
  0x4a   :  { %695 = dma.done.wait [#allocation9], 1024  }
  0x4b   :  { %696 = vsyncadd [#allocation9], 4294966272  ;;  %v703_v1 = vmov 0.0   ;;  %vm704_vm0 = vmmov 0   ;;  %v579_v2 = vld [vmem:[#allocation5] sm:$0xff]   ;;  %v580_v3 = vld [vmem:[#allocation5 + $0x8] sm:$0xff]  }
  0x4c   :  { %511 = vmatprep.subr.bf16.mxu0 %v703_v1  ;;  %527 = vmatprep.mubr.msk.bf16.mxu0 %vm704_vm0, %v703_v1  ;;  %v581_v4 = vld [vmem:[#allocation5 + $0x10] sm:$0xff]   ;;  %v587_v5 = vld [vmem:[#allocation7] sm:$0xff]   ;;  %v582_v6 = vld [vmem:[#allocation5 + $0x18] sm:$0xff]   ;;  %vm446_vm1 = vcmask 7168  }
  0x4d   :  { %531 = vmatprep.subr.bf16.mxu1 %v703_v1  ;;  %547 = vmatprep.mubr.msk.bf16.mxu1 %vm704_vm0, %v703_v1  ;;  %v588_v7 = vld [vmem:[#allocation7 + $0x8] sm:$0xff]   ;;  %v583_v8 = vld [vmem:[#allocation5 + $0x20] sm:$0xff]   ;;  %v589_v9 = vld [vmem:[#allocation7 + $0x10] sm:$0xff]  }
  0x4e   :  { %512 = vmatpush3.bf16.msra.mxu0 %v579_v2  ;;  %532 = vmatpush3.bf16.msra.mxu1 %v587_v5  ;;  %v584_v10 = vld [vmem:[#allocation5 + $0x28] sm:$0xff]   ;;  %v590_v11 = vld [vmem:[#allocation7 + $0x18] sm:$0xff]   ;;  %v585_v12 = vld [vmem:[#allocation5 + $0x30] sm:$0xff]  }
  0x4f   :  { %513 = vmatprep.subr.bf16.mxu0 %v703_v1  ;;  %533 = vmatprep.subr.bf16.mxu1 %v703_v1  ;;  %v591_v13 = vld [vmem:[#allocation7 + $0x20] sm:$0xff]   ;;  %v586_v14 = vld [vmem:[#allocation5 + $0x38] sm:$0xff]   ;;  %v592_v16 = vld [vmem:[#allocation7 + $0x28] sm:$0xff]  }
  0x50   :  { %v88_v15 = vld [vmem:[#allocation3] sm:$0xff]  ;;  %v593_v18 = vld [vmem:[#allocation7 + $0x30] sm:$0xff]   ;;  %v595_v20 = vld [vmem:[#allocation8] sm:$0xff]  }
  0x51   :  { %v89_v17 = vpack.c.bf16 %v88_v15, %v88_v15  ;;  %v594_v19 = vld [vmem:[#allocation7 + $0x38] sm:$0xff]   ;;  %v596_v21 = vld [vmem:[#allocation8 + $0x8] sm:$0xff]   ;;  %v597_v22 = vld [vmem:[#allocation8 + $0x10] sm:$0xff]  }
  0x52   :  { %514 = vmatpush3.bf16.msra.mxu0 %v580_v3  ;;  %534 = vmatpush3.bf16.msra.mxu1 %v588_v7  ;;  %v598_v23 = vld [vmem:[#allocation8 + $0x18] sm:$0xff]   ;;  %v599_v24 = vld [vmem:[#allocation8 + $0x20] sm:$0xff]   ;;  %v600_v25 = vld [vmem:[#allocation8 + $0x28] sm:$0xff]  }
  0x53   :  { %515 = vmatprep.subr.bf16.mxu0 %v703_v1  ;;  %535 = vmatprep.subr.bf16.mxu1 %v703_v1  ;;  %v455_v26 = vld [vmem:[%s862_s2] ss:$0 sm:$0xff]  ;;  %v602_v35 = vld [vmem:[#allocation8 + $0x38] sm:$0xff]  }
  0x54   :  { %v601_v34 = vld [vmem:[#allocation8 + $0x30] sm:$0xff]  }
  0x55   :  { %v464_v36 = vld [vmem:[%s864_s4] ss:$0 sm:$0xff] }
  0x56   :  { %516 = vmatpush3.bf16.msra.mxu0 %v581_v4  ;;  %536 = vmatpush3.bf16.msra.mxu1 %v589_v9  ;;  %v473_v44 = vld [vmem:[%s866_s6] ss:$0 sm:$0xff] }
  0x57   :  { %517 = vmatprep.subr.bf16.mxu0 %v703_v1  ;;  %537 = vmatprep.subr.bf16.mxu1 %v703_v1  ;;  %v482_v49 = vld [vmem:[%s867_s7] ss:$0 sm:$0xff] }
  0x58   :  { %v483_v53 = vld [vmem:[#allocation2] ss:$0 sm:$0xff] }
  0x5a   :  { %518 = vmatpush3.bf16.msra.mxu0 %v582_v6  ;;  %538 = vmatpush3.bf16.msra.mxu1 %v590_v11 }
  0x5b   :  { %519 = vmatprep.subr.bf16.mxu0 %v703_v1  ;;  %539 = vmatprep.subr.bf16.mxu1 %v703_v1 }
  0x5e   :  { %520 = vmatpush3.bf16.msra.mxu0 %v583_v8  ;;  %540 = vmatpush3.bf16.msra.mxu1 %v591_v13 }
  0x5f   :  { %521 = vmatprep.subr.bf16.mxu0 %v703_v1  ;;  %541 = vmatprep.subr.bf16.mxu1 %v703_v1 }
  0x62   :  { %522 = vmatpush3.bf16.msra.mxu0 %v584_v10  ;;  %542 = vmatpush3.bf16.msra.mxu1 %v592_v16 }
  0x63   :  { %523 = vmatprep.subr.bf16.mxu0 %v703_v1  ;;  %543 = vmatprep.subr.bf16.mxu1 %v703_v1 }
  0x66   :  { %524 = vmatpush3.bf16.msra.mxu0 %v585_v12  ;;  %544 = vmatpush3.bf16.msra.mxu1 %v593_v18 }
  0x67   :  { %525 = vmatprep.subr.bf16.mxu0 %v703_v1  ;;  %545 = vmatprep.subr.bf16.mxu1 %v703_v1 }
  0x6a   :  { %526 = vmatpush3.bf16.msra.mxu0 %v586_v14  ;;  %546 = vmatpush3.bf16.msra.mxu1 %v594_v19 }
  0x6b   :  { %551 = vmatprep.subr.bf16.mxu0 %v703_v1 }
  0x6d   :  { %528 = vmatmul.mubr.bf16.vlgmr.msra.gmra.mrb[0].mxu0 %v89_v17 }
  0x6e   :  { %567 = vmatprep.mubr.msk.bf16.mxu0 %vm704_vm0, %v703_v1  ;;  %552 = vmatpush3.bf16.msra.mxu0 %v595_v20 }
  0x6f   :  { %553 = vmatprep.subr.bf16.mxu0 %v703_v1 }
  0x72   :  { %554 = vmatpush3.bf16.msra.mxu0 %v596_v21 }
  0x73   :  { %555 = vmatprep.subr.bf16.mxu0 %v703_v1 }
  0x76   :  { %556 = vmatpush3.bf16.msra.mxu0 %v597_v22 }
  0x77   :  { %557 = vmatprep.subr.bf16.mxu0 %v703_v1 }
  0x7a   :  { %558 = vmatpush3.bf16.msra.mxu0 %v598_v23 }
  0x7b   :  { %559 = vmatprep.subr.bf16.mxu0 %v703_v1 }
  0x7e   :  { %560 = vmatpush3.bf16.msra.mxu0 %v599_v24 }
  0x7f   :  { %561 = vmatprep.subr.bf16.mxu0 %v703_v1 }
  0x82   :  { %562 = vmatpush3.bf16.msra.mxu0 %v600_v25 }
  0x83   :  { %563 = vmatprep.subr.bf16.mxu0 %v703_v1 }
  0x86   :  { %564 = vmatpush3.bf16.msra.mxu0 %v601_v34 }
  0x87   :  { %565 = vmatprep.subr.bf16.mxu0 %v703_v1 }
  0x8a   :  { %566 = vmatpush3.bf16.msra.mxu0 %v602_v35 }
 0x140   :  { %v195_v27 = vpop.f32.mrb[0].mxu0 }
 0x141   :  { %v196_v28 = vadd.f32 %v455_v26, %v195_v27  ;;  %v529_v29 = vpop.f32.mrb[1].mxu0 }
 0x142   :  { %v198_v30 = vpop.f32.mrb[2].mxu0 }
 0x143   :  { %v201_v31 = vmax.f32 %v196_v28, 0.0  ;;  %v530_v32 = vpop.f32.mrb[3].mxu0 }
 0x145   :  { %v202_v33 = vpack.c.bf16 %v201_v31, %v201_v31 }
 0x147   :  { %548 = vmatmul.mubr.bf16.vlgmr.msra.gmra.mrb[0].mxu1 %v202_v33 }
 0x21a   :  { %v308_v37 = vpop.f32.mrb[0].mxu1 }
 0x21b   :  { %v309_v38 = vadd.f32 %v464_v36, %v308_v37  ;;  %v549_v39 = vpop.f32.mrb[1].mxu1 }
 0x21c   :  { %v311_v40 = vpop.f32.mrb[2].mxu1 }
 0x21d   :  { %v314_v41 = vmax.f32 %v309_v38, 0.0  ;;  %v550_v42 = vpop.f32.mrb[3].mxu1 }
 0x21f   :  { %v315_v43 = vpack.c.bf16 %v314_v41, %v314_v41 }
 0x221   :  { %568 = vmatmul.mubr.bf16.vlgmr.msra.gmra.mrb[4].mxu0 %v315_v43 }
 0x2f4   :  { %v421_v45 = vpop.f32.mrb[4].mxu0 }
 0x2f5   :  { %v422_v46 = vadd.f32 %v473_v44, %v421_v45  ;;  %v569_v47 = vpop.f32.mrb[5].mxu0 }
 0x2f6   :  { %v424_v48 = vpop.f32.mrb[6].mxu0 }
 0x2f7   :  { %v427_v50 = vmax.f32 %v422_v46, 0.0  ;;  %v570_v51 = vpop.f32.mrb[7].mxu0 }
 0x2f9   :  { %v435_v52 = vmul.f32 %v482_v49, %v427_v50 }
 0x2fb   :  { %436 = vadd.xlane.f32.xlu0 %v435_v52 }
 0x388   :  { %v437_v54 = vpop.xlane.xlu0 %436 }
 0x389   :  { %v445_v55 = vadd.f32 %v483_v53, %v437_v54 }
 0x38b   :  { %447 = vst.msk [vmem:[%s869_s9] sm:$0xff] %vm446_vm1, %v445_v55 }
 0x38c   :  { %452 = vsyncpa [#allocation4], 1 }
 0x38d   :  { %453 = vsyncpa [#allocation6], 1 }
 0x38e   :  { %454 = vsyncpa [#allocation9], 1 }

</bundles_post_ra>
